<compile_context>
chip_gen: v6e
topology: v6e:2x2x1
jax: 0.10.0
libtpu: 0.0.40
codegen_flags: <defaults>
</compile_context>

<pallas_src>
import functools

import jax
import jax.numpy as jnp
from jax.experimental import pallas as pl
from jax.experimental.pallas import tpu as pltpu


def ct_encoder_kernel(patches_ref, wpe_ref, bpe_ref, w1_ref, b1_ref,
                      w2_ref, b2_ref, gamma_ref, beta_ref,
                      weight_ref, x_ref, *, bblk, n_patches):
    n = n_patches

    # ---- patch embedding: the stride-p conv expressed as one flat matmul ----
    p = patches_ref[...]                                            # (R, Cpp), R = bblk*N
    emb = jnp.dot(p, wpe_ref[...],
                  preferred_element_type=jnp.float32) + bpe_ref[...]  # (R, D)
    d = emb.shape[-1]
    inv_d = 1.0 / d

    # ---- AdaptiveAvg/MaxPool2d((N, 1)) == reduce over embed dim D ----
    max_out = jnp.max(emb, axis=-1, keepdims=True)                  # (R, 1)
    avg_out = jnp.sum(emb, axis=-1, keepdims=True) * inv_d          # (R, 1)

    # ---- shared fc, batched over {avg, max} x bblk as 2*bblk columns ----
    # PyTorch Linear: y = x @ W^T + b  ->  column form y_col = W @ x_col + b_col.
    cols = ([avg_out[b * n:(b + 1) * n, :] for b in range(bblk)]
            + [max_out[b * n:(b + 1) * n, :] for b in range(bblk)])
    pooled = jnp.concatenate(cols, axis=1)                          # (N, 2*bblk)

    h = jnp.dot(w1_ref[...], pooled,
                preferred_element_type=jnp.float32) + b1_ref[...]   # (Hh, 2*bblk)
    h = jnp.maximum(h, 0.0)
    o = jnp.dot(w2_ref[...], h,
                preferred_element_type=jnp.float32) + b2_ref[...]   # (N, 2*bblk)
    logits = o[:, :bblk] + o[:, bblk:]                              # avg + max, (N, bblk)
    wgt_cols = jax.nn.sigmoid(logits)                               # (N, bblk)

    # Lane-dense store of the attention weights (last dim = N, not 1).
    weight_ref[...] = jnp.transpose(wgt_cols).astype(weight_ref.dtype)  # (bblk, N)

    # ---- gate the embeddings, then LayerNorm over D (eps = 1e-5) ----
    w_col = jnp.concatenate([wgt_cols[:, b:b + 1] for b in range(bblk)],
                            axis=0)                                 # (R, 1), row-aligned with emb
    scaled = emb * w_col                                            # (R, D)

    # Fused single-pass statistics: mu = E[x], var = E[x^2] - mu^2.
    s1 = jnp.sum(scaled, axis=-1, keepdims=True)
    s2 = jnp.sum(scaled * scaled, axis=-1, keepdims=True)
    mu = s1 * inv_d
    var = s2 * inv_d - mu * mu
    normed = (scaled - mu) * jax.lax.rsqrt(var + 1e-5)
    x_ref[...] = (normed * gamma_ref[...] + beta_ref[...]).astype(x_ref.dtype)


def extract_patches(x, patch_size):
    """(B, C, H, W) NCHW -> (B, N, C*p*p), matching Conv2d(k=p, stride=p) patch order."""
    B, C, H, W = x.shape
    p = patch_size
    Hp, Wp = H // p, W // p
    x = x.reshape(B, C, Hp, p, Wp, p)
    x = x.transpose(0, 2, 4, 1, 3, 5)                               # (B, Hp, Wp, C, p, p)
    return x.reshape(B, Hp * Wp, C * p * p)


def _choose_batch_block(batch, n_patches, target_rows=512):
    """Largest divisor of `batch` with bblk*N <= ~target_rows.

    Also respects the (8,128) block rule for the (B, N) weight output: the
    block's second-to-last dim must be a multiple of 8 or equal the full dim.
    """
    limit = min(batch, max(1, target_rows // n_patches))
    for cand in range(limit, 0, -1):
        if batch % cand == 0 and (cand == batch or cand % 8 == 0):
            return cand
    return batch


@functools.partial(jax.jit, static_argnames=("patch_size",))
def ct_encoder_forward(x, params, patch_size):
    patches = extract_patches(x, patch_size)                        # (B, N, Cpp)
    B, N, Cpp = patches.shape
    D = params["wpe"].shape[1]
    Hh = params["w1"].shape[0]

    bblk = _choose_batch_block(B, N)
    grid = (B // bblk,)
    R = bblk * N                                                    # rows per grid step

    patches2 = patches.reshape(B * N, Cpp)                          # flat rows for the kernel
    bpe = params["bpe"].reshape(1, D)
    b1 = params["b1"].reshape(Hh, 1)
    b2 = params["b2"].reshape(N, 1)
    gamma = params["gamma"].reshape(1, D)
    beta = params["beta"].reshape(1, D)

    kern = functools.partial(ct_encoder_kernel, bblk=bblk, n_patches=N)

    weight2, out2 = pl.pallas_call(
        kern,
        out_shape=(
            jax.ShapeDtypeStruct((B, N), jnp.float32),              # lane-dense weights
            jax.ShapeDtypeStruct((B * N, D), jnp.float32),          # flat (rows, D) output
        ),
        grid=grid,
        in_specs=[
            pl.BlockSpec((R, Cpp), lambda b: (b, 0)),               # patches (rows)
            pl.BlockSpec((Cpp, D), lambda b: (0, 0)),               # wpe   (resident)
            pl.BlockSpec((1, D), lambda b: (0, 0)),                 # bpe
            pl.BlockSpec((Hh, N), lambda b: (0, 0)),                # w1
            pl.BlockSpec((Hh, 1), lambda b: (0, 0)),                # b1
            pl.BlockSpec((N, Hh), lambda b: (0, 0)),                # w2
            pl.BlockSpec((N, 1), lambda b: (0, 0)),                 # b2
            pl.BlockSpec((1, D), lambda b: (0, 0)),                 # gamma
            pl.BlockSpec((1, D), lambda b: (0, 0)),                 # beta
        ],
        out_specs=(
            pl.BlockSpec((bblk, N), lambda b: (b, 0)),
            pl.BlockSpec((R, D), lambda b: (b, 0)),
        ),
        compiler_params=pltpu.CompilerParams(
            dimension_semantics=("parallel",),
            vmem_limit_bytes=32 * 1024 * 1024),
    )(patches2, params["wpe"], bpe, params["w1"], b1,
      params["w2"], b2, gamma, beta)

    weight = weight2.reshape(B, N, 1)                               # match PyTorch shape
    out = out2.reshape(B, N, D)
    return weight, out


def reference_forward(x, params, patch_size):
    """Pure-JAX reference matching the PyTorch forward semantics."""
    patches = extract_patches(x, patch_size)
    emb = patches @ params["wpe"] + params["bpe"]                   # (B, N, D)
    mx = emb.max(-1)                                                # (B, N)
    av = emb.mean(-1)

    def fc(v):
        h = jnp.maximum(v @ params["w1"].T + params["b1"], 0.0)
        return h @ params["w2"].T + params["b2"]

    w = jax.nn.sigmoid(fc(av) + fc(mx))[..., None]                  # (B, N, 1)
    s = emb * w
    mu = s.mean(-1, keepdims=True)
    var = ((s - mu) ** 2).mean(-1, keepdims=True)
    out = (s - mu) / jnp.sqrt(var + 1e-5) * params["gamma"] + params["beta"]
    return w, out


if __name__ == "__main__":
    # Small config consistent with the module's constructor math:
    #   N = (img_size / patch_size)^2, hidden = int(N / reduction_ratio)
    B, img_size, patch_size, in_channels = 2, 16, 2, 4
    embed_dim, reduction_ratio = 32, 14
    N = (img_size // patch_size) ** 2                               # 64
    Cpp = in_channels * patch_size * patch_size                     # 16
    Hh = int(N / reduction_ratio)                                   # 4

    key = jax.random.PRNGKey(0)
    ks = jax.random.split(key, 8)
    params = dict(
        wpe=0.02 * jax.random.normal(ks[0], (Cpp, embed_dim), jnp.float32),
        bpe=0.01 * jax.random.normal(ks[1], (embed_dim,), jnp.float32),
        w1=0.1 * jax.random.normal(ks[2], (Hh, N), jnp.float32),
        b1=0.01 * jax.random.normal(ks[3], (Hh,), jnp.float32),
        w2=0.1 * jax.random.normal(ks[4], (N, Hh), jnp.float32),
        b2=0.01 * jax.random.normal(ks[5], (N,), jnp.float32),
        gamma=jnp.ones((embed_dim,), jnp.float32),
        beta=jnp.zeros((embed_dim,), jnp.float32),
    )
    x = jax.random.normal(ks[6], (B, in_channels, img_size, img_size),
                          jnp.float32)

    weight, out = ct_encoder_forward(x, params, patch_size)
    jax.block_until_ready((weight, out))

    w_ref, out_ref = reference_forward(x, params, patch_size)
    assert weight.shape == (B, N, 1) and out.shape == (B, N, embed_dim)
    assert jnp.allclose(weight, w_ref, atol=1e-5), "weight mismatch"
    assert jnp.allclose(out, out_ref, atol=1e-4), "output mismatch"
    print("KERNEL_OK")
</pallas_src>

<mosaic_0001>
module attributes {stable_mosaic.version = 11 : i64} {
  func.func @ct_encoder_kernel(%arg0: i32, %arg1: memref<128x16xf32, #tpu.memory_space<vmem>>, %arg2: memref<16x32xf32, #tpu.memory_space<vmem>>, %arg3: memref<1x32xf32, #tpu.memory_space<vmem>>, %arg4: memref<4x64xf32, #tpu.memory_space<vmem>>, %arg5: memref<4x1xf32, #tpu.memory_space<vmem>>, %arg6: memref<64x4xf32, #tpu.memory_space<vmem>>, %arg7: memref<64x1xf32, #tpu.memory_space<vmem>>, %arg8: memref<1x32xf32, #tpu.memory_space<vmem>>, %arg9: memref<1x32xf32, #tpu.memory_space<vmem>>, %arg10: memref<2x64xf32, #tpu.memory_space<vmem>>, %arg11: memref<128x32xf32, #tpu.memory_space<vmem>>) attributes {dimension_semantics = [#tpu.dimension_semantics<parallel>], iteration_bounds = array<i64: 1>, scalar_prefetch = 0 : i64, scratch_operands = 0 : i64, tpu.core_type = #tpu.core_type<tc>, window_params = [{transform_indices = @transform_0, window_bounds = array<i64: 128, 16>}, {pipeline_mode = #tpu.pipeline_mode<synchronous>, transform_indices = @transform_1, window_bounds = array<i64: 16, 32>}, {pipeline_mode = #tpu.pipeline_mode<synchronous>, transform_indices = @transform_2, window_bounds = array<i64: 1, 32>}, {pipeline_mode = #tpu.pipeline_mode<synchronous>, transform_indices = @transform_3, window_bounds = array<i64: 4, 64>}, {pipeline_mode = #tpu.pipeline_mode<synchronous>, transform_indices = @transform_4, window_bounds = array<i64: 4, 1>}, {pipeline_mode = #tpu.pipeline_mode<synchronous>, transform_indices = @transform_5, window_bounds = array<i64: 64, 4>}, {pipeline_mode = #tpu.pipeline_mode<synchronous>, transform_indices = @transform_6, window_bounds = array<i64: 64, 1>}, {pipeline_mode = #tpu.pipeline_mode<synchronous>, transform_indices = @transform_7, window_bounds = array<i64: 1, 32>}, {pipeline_mode = #tpu.pipeline_mode<synchronous>, transform_indices = @transform_8, window_bounds = array<i64: 1, 32>}, {transform_indices = @transform_9, window_bounds = array<i64: 2, 64>}, {transform_indices = @transform_10, window_bounds = array<i64: 128, 32>}]} {
    %c0 = arith.constant 0 : index
    %c0_0 = arith.constant 0 : index
    %0 = vector.load %arg1[%c0, %c0_0] : memref<128x16xf32, #tpu.memory_space<vmem>>, vector<128x16xf32>
    %c0_1 = arith.constant 0 : index
    %c0_2 = arith.constant 0 : index
    %1 = vector.load %arg2[%c0_1, %c0_2] : memref<16x32xf32, #tpu.memory_space<vmem>>, vector<16x32xf32>
    %cst = arith.constant dense<0.000000e+00> : vector<128x32xf32>
    %2 = tpu.matmul %0, %1, %cst {dimension_numbers = #tpu.dot_dimension_numbers<[1], [0], [0], [1], [0, 0, 1, 1], [], []>} : vector<128x16xf32>, vector<16x32xf32>, vector<128x32xf32> -> vector<128x32xf32>
    %c0_3 = arith.constant 0 : index
    %c0_4 = arith.constant 0 : index
    %3 = vector.load %arg3[%c0_3, %c0_4] : memref<1x32xf32, #tpu.memory_space<vmem>>, vector<1x32xf32>
    %4 = vector.broadcast %3 : vector<1x32xf32> to vector<128x32xf32>
    %5 = arith.addf %2, %4 : vector<128x32xf32>
    %cst_5 = arith.constant dense<0xFF800000> : vector<128xf32>
    %6 = vector.multi_reduction <maximumf>, %5, %cst_5 [1] : vector<128x32xf32> to vector<128xf32>
    %7 = vector.shape_cast %6 : vector<128xf32> to vector<128x1xf32>
    %cst_6 = arith.constant dense<0.000000e+00> : vector<128xf32>
    %8 = vector.multi_reduction <add>, %5, %cst_6 [1] : vector<128x32xf32> to vector<128xf32>
    %9 = vector.shape_cast %8 : vector<128xf32> to vector<128x1xf32>
    %cst_7 = arith.constant 3.125000e-02 : f32
    %10 = vector.broadcast %cst_7 : f32 to vector<128x1xf32>
    %11 = arith.mulf %9, %10 : vector<128x1xf32>
    %12 = vector.extract_strided_slice %11 {offsets = [0, 0], sizes = [64, 1], strides = [1, 1]} : vector<128x1xf32> to vector<64x1xf32>
    %13 = vector.extract_strided_slice %11 {offsets = [64, 0], sizes = [64, 1], strides = [1, 1]} : vector<128x1xf32> to vector<64x1xf32>
    %14 = vector.extract_strided_slice %7 {offsets = [0, 0], sizes = [64, 1], strides = [1, 1]} : vector<128x1xf32> to vector<64x1xf32>
    %15 = vector.extract_strided_slice %7 {offsets = [64, 0], sizes = [64, 1], strides = [1, 1]} : vector<128x1xf32> to vector<64x1xf32>
    %16 = tpu.concatenate %12, %13, %14, %15 in 1 : vector<64x1xf32>, vector<64x1xf32>, vector<64x1xf32>, vector<64x1xf32> -> vector<64x4xf32>
    %c0_8 = arith.constant 0 : index
    %c0_9 = arith.constant 0 : index
    %17 = vector.load %arg4[%c0_8, %c0_9] : memref<4x64xf32, #tpu.memory_space<vmem>>, vector<4x64xf32>
    %cst_10 = arith.constant dense<0.000000e+00> : vector<4x4xf32>
    %18 = tpu.matmul %17, %16, %cst_10 {dimension_numbers = #tpu.dot_dimension_numbers<[1], [0], [0], [1], [0, 0, 1, 1], [], []>} : vector<4x64xf32>, vector<64x4xf32>, vector<4x4xf32> -> vector<4x4xf32>
    %c0_11 = arith.constant 0 : index
    %c0_12 = arith.constant 0 : index
    %19 = vector.load %arg5[%c0_11, %c0_12] : memref<4x1xf32, #tpu.memory_space<vmem>>, vector<4x1xf32>
    %20 = vector.broadcast %19 : vector<4x1xf32> to vector<4x4xf32>
    %21 = arith.addf %18, %20 : vector<4x4xf32>
    %cst_13 = arith.constant 0.000000e+00 : f32
    %22 = vector.broadcast %cst_13 : f32 to vector<4x4xf32>
    %23 = arith.maximumf %21, %22 : vector<4x4xf32>
    %c0_14 = arith.constant 0 : index
    %c0_15 = arith.constant 0 : index
    %24 = vector.load %arg6[%c0_14, %c0_15] : memref<64x4xf32, #tpu.memory_space<vmem>>, vector<64x4xf32>
    %cst_16 = arith.constant dense<0.000000e+00> : vector<64x4xf32>
    %25 = tpu.matmul %24, %23, %cst_16 {dimension_numbers = #tpu.dot_dimension_numbers<[1], [0], [0], [1], [0, 0, 1, 1], [], []>} : vector<64x4xf32>, vector<4x4xf32>, vector<64x4xf32> -> vector<64x4xf32>
    %c0_17 = arith.constant 0 : index
    %c0_18 = arith.constant 0 : index
    %26 = vector.load %arg7[%c0_17, %c0_18] : memref<64x1xf32, #tpu.memory_space<vmem>>, vector<64x1xf32>
    %27 = vector.broadcast %26 : vector<64x1xf32> to vector<64x4xf32>
    %28 = arith.addf %25, %27 : vector<64x4xf32>
    %29 = vector.extract_strided_slice %28 {offsets = [0, 0], sizes = [64, 2], strides = [1, 1]} : vector<64x4xf32> to vector<64x2xf32>
    %30 = vector.extract_strided_slice %28 {offsets = [0, 2], sizes = [64, 2], strides = [1, 1]} : vector<64x4xf32> to vector<64x2xf32>
    %31 = arith.addf %29, %30 : vector<64x2xf32>
    %32 = arith.negf %31 : vector<64x2xf32>
    %33 = math.exp %32 : vector<64x2xf32>
    %cst_19 = arith.constant 1.000000e+00 : f32
    %34 = vector.broadcast %cst_19 : f32 to vector<64x2xf32>
    %35 = arith.addf %34, %33 : vector<64x2xf32>
    %36 = arith.divf %34, %35 : vector<64x2xf32>
    %37 = tpu.transpose %36, [1, 0] : vector<64x2xf32> -> vector<2x64xf32>
    %c0_20 = arith.constant 0 : index
    %c0_21 = arith.constant 0 : index
    %38 = vector.load %arg10[%c0_20, %c0_21] : memref<2x64xf32, #tpu.memory_space<vmem>>, vector<2x64xf32>
    tpu.vector_store %arg10[%c0_20, %c0_21], %37 {strides = array<i32>} : memref<2x64xf32, #tpu.memory_space<vmem>>, vector<2x64xf32>,
    %39 = vector.extract_strided_slice %36 {offsets = [0, 0], sizes = [64, 1], strides = [1, 1]} : vector<64x2xf32> to vector<64x1xf32>
    %40 = vector.extract_strided_slice %36 {offsets = [0, 1], sizes = [64, 1], strides = [1, 1]} : vector<64x2xf32> to vector<64x1xf32>
    %41 = tpu.concatenate %39, %40 in 0 : vector<64x1xf32>, vector<64x1xf32> -> vector<128x1xf32>
    %42 = vector.broadcast %41 : vector<128x1xf32> to vector<128x32xf32>
    %43 = arith.mulf %5, %42 : vector<128x32xf32>
    %cst_22 = arith.constant dense<0.000000e+00> : vector<128xf32>
    %44 = vector.multi_reduction <add>, %43, %cst_22 [1] : vector<128x32xf32> to vector<128xf32>
    %45 = vector.shape_cast %44 : vector<128xf32> to vector<128x1xf32>
    %46 = arith.mulf %43, %43 : vector<128x32xf32>
    %cst_23 = arith.constant dense<0.000000e+00> : vector<128xf32>
    %47 = vector.multi_reduction <add>, %46, %cst_23 [1] : vector<128x32xf32> to vector<128xf32>
    %48 = vector.shape_cast %47 : vector<128xf32> to vector<128x1xf32>
    %cst_24 = arith.constant 3.125000e-02 : f32
    %49 = vector.broadcast %cst_24 : f32 to vector<128x1xf32>
    %50 = arith.mulf %45, %49 : vector<128x1xf32>
    %cst_25 = arith.constant 3.125000e-02 : f32
    %51 = vector.broadcast %cst_25 : f32 to vector<128x1xf32>
    %52 = arith.mulf %48, %51 : vector<128x1xf32>
    %53 = arith.mulf %50, %50 : vector<128x1xf32>
    %54 = arith.subf %52, %53 : vector<128x1xf32>
    %55 = vector.broadcast %50 : vector<128x1xf32> to vector<128x32xf32>
    %56 = arith.subf %43, %55 : vector<128x32xf32>
    %cst_26 = arith.constant 9.99999974E-6 : f32
    %57 = vector.broadcast %cst_26 : f32 to vector<128x1xf32>
    %58 = arith.addf %54, %57 : vector<128x1xf32>
    %59 = math.rsqrt %58 : vector<128x1xf32>
    %60 = vector.broadcast %59 : vector<128x1xf32> to vector<128x32xf32>
    %61 = arith.mulf %56, %60 : vector<128x32xf32>
    %c0_27 = arith.constant 0 : index
    %c0_28 = arith.constant 0 : index
    %62 = vector.load %arg8[%c0_27, %c0_28] : memref<1x32xf32, #tpu.memory_space<vmem>>, vector<1x32xf32>
    %63 = vector.broadcast %62 : vector<1x32xf32> to vector<128x32xf32>
    %64 = arith.mulf %61, %63 : vector<128x32xf32>
    %c0_29 = arith.constant 0 : index
    %c0_30 = arith.constant 0 : index
    %65 = vector.load %arg9[%c0_29, %c0_30] : memref<1x32xf32, #tpu.memory_space<vmem>>, vector<1x32xf32>
    %66 = vector.broadcast %65 : vector<1x32xf32> to vector<128x32xf32>
    %67 = arith.addf %64, %66 : vector<128x32xf32>
    %c0_31 = arith.constant 0 : index
    %c0_32 = arith.constant 0 : index
    %68 = vector.load %arg11[%c0_31, %c0_32] : memref<128x32xf32, #tpu.memory_space<vmem>>, vector<128x32xf32>
    tpu.vector_store %arg11[%c0_31, %c0_32], %67 {strides = array<i32>} : memref<128x32xf32, #tpu.memory_space<vmem>>, vector<128x32xf32>,
    return
  }
  func.func @transform_0(%arg0: i32) -> (i32, i32) {
    %c0_i32 = arith.constant 0 : i32
    %c0_i32_0 = arith.constant 0 : i32
    return %arg0, %c0_i32 : i32, i32
  }
  func.func @transform_1(%arg0: i32) -> (i32, i32) {
    %c0_i32 = arith.constant 0 : i32
    %c0_i32_0 = arith.constant 0 : i32
    %c0_i32_1 = arith.constant 0 : i32
    return %c0_i32, %c0_i32_0 : i32, i32
  }
  func.func @transform_2(%arg0: i32) -> (i32, i32) {
    %c0_i32 = arith.constant 0 : i32
    %c0_i32_0 = arith.constant 0 : i32
    %c0_i32_1 = arith.constant 0 : i32
    return %c0_i32, %c0_i32_0 : i32, i32
  }
  func.func @transform_3(%arg0: i32) -> (i32, i32) {
    %c0_i32 = arith.constant 0 : i32
    %c0_i32_0 = arith.constant 0 : i32
    %c0_i32_1 = arith.constant 0 : i32
    return %c0_i32, %c0_i32_0 : i32, i32
  }
  func.func @transform_4(%arg0: i32) -> (i32, i32) {
    %c0_i32 = arith.constant 0 : i32
    %c0_i32_0 = arith.constant 0 : i32
    %c0_i32_1 = arith.constant 0 : i32
    return %c0_i32, %c0_i32_0 : i32, i32
  }
  func.func @transform_5(%arg0: i32) -> (i32, i32) {
    %c0_i32 = arith.constant 0 : i32
    %c0_i32_0 = arith.constant 0 : i32
    %c0_i32_1 = arith.constant 0 : i32
    return %c0_i32, %c0_i32_0 : i32, i32
  }
  func.func @transform_6(%arg0: i32) -> (i32, i32) {
    %c0_i32 = arith.constant 0 : i32
    %c0_i32_0 = arith.constant 0 : i32
    %c0_i32_1 = arith.constant 0 : i32
    return %c0_i32, %c0_i32_0 : i32, i32
  }
  func.func @transform_7(%arg0: i32) -> (i32, i32) {
    %c0_i32 = arith.constant 0 : i32
    %c0_i32_0 = arith.constant 0 : i32
    %c0_i32_1 = arith.constant 0 : i32
    return %c0_i32, %c0_i32_0 : i32, i32
  }
  func.func @transform_8(%arg0: i32) -> (i32, i32) {
    %c0_i32 = arith.constant 0 : i32
    %c0_i32_0 = arith.constant 0 : i32
    %c0_i32_1 = arith.constant 0 : i32
    return %c0_i32, %c0_i32_0 : i32, i32
  }
  func.func @transform_9(%arg0: i32) -> (i32, i32) {
    %c0_i32 = arith.constant 0 : i32
    %c0_i32_0 = arith.constant 0 : i32
    return %arg0, %c0_i32 : i32, i32
  }
  func.func @transform_10(%arg0: i32) -> (i32, i32) {
    %c0_i32 = arith.constant 0 : i32
    %c0_i32_0 = arith.constant 0 : i32
    return %arg0, %c0_i32 : i32, i32
  }
}

</mosaic_0001>

<bundles_post_ra>
// kernel: ct_encoder_forward.1
= control target key start
LH: loop header
LB: loop body
LE: loop exit
PB: predicated region body
PF: predicated region fallthrough
CT: control target
= control target key end

     0   :  { %vm60_vm0 = vcmask 130048   ;;  %s2096_s0 = inlined_call_operand.vmem [shape: f32[128,16], index: 0, kind: input, shape index: {}]   ;;  %s2097_s1 = inlined_call_operand.vmem [shape: f32[16,32], index: 1, kind: input, shape index: {}]   ;;  %s2098_s2 = inlined_call_operand.vmem [shape: f32[1,32], index: 2, kind: input, shape index: {}]   ;;  %s2099_s3 = inlined_call_operand.vmem [shape: f32[4,64], index: 3, kind: input, shape index: {}]   ;;  %s2100_s4 = inlined_call_operand.vmem [shape: f32[4,1], index: 4, kind: input, shape index: {}]   ;;  %s2101_s5 = inlined_call_operand.vmem [shape: f32[64,4], index: 5, kind: input, shape index: {}]   ;;  %s2102_s6 = inlined_call_operand.vmem [shape: f32[64,1], index: 6, kind: input, shape index: {}]   ;;  %s2103_s7 = inlined_call_operand.vmem [shape: f32[1,32], index: 7, kind: input, shape index: {}]   ;;  %s2104_s8 = inlined_call_operand.vmem [shape: f32[1,32], index: 8, kind: input, shape index: {}]   ;;  %s2105_s9 = inlined_call_operand.hbm [shape: f32[2,64], index: 9, kind: output, shape index: {0}]   ;;  %s2106_s10 = inlined_call_operand.vmem [shape: f32[128,32], index: 10, kind: output, shape index: {1}]  }
   0x1   :  { %v52_v0 = vld [vmem:[%s2097_s1 + $0x8] sm:$0xff]  ;;  %v51_v1 = vld [vmem:[%s2097_s1] sm:$0xff]  ;;  %v37_v4 = vld [vmem:[%s2096_s0 + $0x10] sm:$0xff] }
   0x2   :  { %v35_v2 = vld [vmem:[%s2096_s0] sm:$0xff]  ;;  %1285 = vmatprep.subr.mxu0 %v52_v0  ;;  %v36_v3 = vld [vmem:[%s2096_s0 + $0x8] sm:$0xff]  ;;  %v38_v5 = vld [vmem:[%s2096_s0 + $0x18] sm:$0xff] }
   0x3   :  { %1289 = vmatprep.mubr.msk.f32.mxu0 %vm60_vm0, %v35_v2  ;;  %1286 = vmatpush3.msra.mxu0 %v52_v0 }
   0x4   :  { %1287 = vmatprep.subr.mxu0 %v51_v1 }
   0x5   :  { %1288 = vmatpush3.msra.mxu0 %v51_v1 }
   0x6   :  { %1290 = vmatmul.mubr.msk.f32.vlgmr.msra.gmra.mxu0 %vm60_vm0, %v36_v3 }
   0x7   :  { %1292 = vmatprep.mubr.msk.f32.mxu0 %vm60_vm0, %v37_v4 }
   0x8   :  { %16 = vsyncpa [#allocation3], 0  ;;  %v39_v6 = vld [vmem:[%s2096_s0 + $0x20] sm:$0xff]  ;;  %v40_v7 = vld [vmem:[%s2096_s0 + $0x28] sm:$0xff]  ;;  %vm254_vm1 = vcmask 261120   ;;  %vm1441_vm2 = vmmov 0  }
   0x9   :  { %v41_v8 = vld [vmem:[%s2096_s0 + $0x30] sm:$0xff]  ;;  %v42_v9 = vld [vmem:[%s2096_s0 + $0x38] sm:$0xff]  ;;  %v43_v10 = vld [vmem:[%s2096_s0 + $0x40] sm:$0xff]  ;;  %vm367_vm3 = vcmask 7168   ;;  %vm376_vm4 = vcmask 15360   ;;  %vm385_vm5 = vcmask 23552  }
   0xa   :  { %1293 = vmatmul.mubr.msk.f32.gmra.mxu0 %vm60_vm0, %v38_v5  ;;  %v44_v11 = vld [vmem:[%s2096_s0 + $0x48] sm:$0xff]  ;;  %v45_v12 = vld [vmem:[%s2096_s0 + $0x50] sm:$0xff]  ;;  %v46_v13 = vld [vmem:[%s2096_s0 + $0x58] sm:$0xff]  ;;  %vm401_vm6 = vcmask 523264   ;;  %vm532_vm7 = vcmask 31744   ;;  %vm557_vm8 = vcmask 1043456  }
   0xb   :  { %1295 = vmatprep.mubr.msk.f32.mxu0 %vm60_vm0, %v39_v6  ;;  %v47_v14 = vld [vmem:[%s2096_s0 + $0x60] sm:$0xff]  ;;  %v48_v15 = vld [vmem:[%s2096_s0 + $0x68] sm:$0xff]  ;;  %v49_v16 = vld [vmem:[%s2096_s0 + $0x70] sm:$0xff]  ;;  %s1443_s15 = smov 126   ;;  %vm786_vm9 = vcmask 517120   ;;  %s1445_s22 = smov [#allocation2]  }
   0xc   :  { %v50_v17 = vld [vmem:[%s2096_s0 + $0x78] sm:$0xff]  ;;  %v1578_v20 = vld [vmem:[%s2098_s2] ss:$0 sm:$0xff]  ;;  %s1200_s1 = sshll.u32 %s1445_s22, 4  ;;  %s1201_s1 = int_to_ptr.vmem [resolvable:$true] %s1200_s1 }
   0xd   :  { %p1423_p1 = scmp.lt.s32.totalorder %s1201_s1, %s1201_s1 }
   0xe   :  { %1296 = vmatmul.mubr.msk.f32.gmra.mxu0 %vm60_vm0, %v40_v7 }
   0xf   :  { %1298 = vmatprep.mubr.msk.f32.mxu0 %vm60_vm0, %v41_v8 }
  0x12   :  { %1299 = vmatmul.mubr.msk.f32.gmra.mxu0 %vm60_vm0, %v42_v9 }
  0x13   :  { %1301 = vmatprep.mubr.msk.f32.mxu0 %vm60_vm0, %v43_v10 }
  0x16   :  { %1302 = vmatmul.mubr.msk.f32.gmra.mxu0 %vm60_vm0, %v44_v11 }
  0x17   :  { %1304 = vmatprep.mubr.msk.f32.mxu0 %vm60_vm0, %v45_v12 }
  0x1a   :  { %1305 = vmatmul.mubr.msk.f32.gmra.mxu0 %vm60_vm0, %v46_v13 }
  0x1b   :  { %1307 = vmatprep.mubr.msk.f32.mxu0 %vm60_vm0, %v47_v14 }
  0x1e   :  { %1308 = vmatmul.mubr.msk.f32.gmra.mxu0 %vm60_vm0, %v48_v15 }
  0x1f   :  { %1310 = vmatprep.mubr.msk.f32.mxu0 %vm60_vm0, %v49_v16  ;;  %v1440_v16 = vmov 0.0  }
  0x20   :  { %1313 = vmatprep.subr.mxu1 %v1440_v16  ;;  %1329 = vmatprep.mubr.msk.f32.mxu1 %vm1441_vm2, %v1440_v16 }
  0x22   :  { %1311 = vmatmul.mubr.msk.f32.gmra.mxu0 %vm60_vm0, %v50_v17 }
  0xc6   :  { %v1571_v18 = vpop.f32.mrf.mxu0 }
  0xc7   :  { %v1653_v63 = vadd.f32 %v1571_v18, %v1578_v20 }
  0xc8   :  { %v1573_v19 = vpop.f32.mrf.mxu0 }
  0xc9   :  { %v306_v3 = vsel %vm254_vm1, %v1653_v63, 0.0  ;;  %v1666_v4 = vadd.f32 %v1578_v20, %v1573_v19  ;;  %v258_v12 = vsel %vm254_vm1, %v1653_v63, -inf }
  0xca   :  { %v1294_v21 = vpop.f32.mrf.mxu0 }
  0xcb   :  { %v1581_v22 = vadd.f32 %v1294_v21, %v1578_v20  ;;  %v303_v10 = vsel %vm254_vm1, %v1666_v4, 0.0  ;;  %v255_v15 = vsel %vm254_vm1, %v1666_v4, -inf  ;;  %v1442_v21 = vmov 0  }
  0xcc   :  { %v185_v23 = vpop.f32.mrf.mxu0  ;;  %1352 = vset.pattern.permute.xlu0 %v1442_v21  ;;  %1353 = vset.pattern.permute.xlu1 %v1442_v21 }
  0xcd   :  { %v312_v24 = vsel %vm254_vm1, %v1581_v22, 0.0  ;;  %v1586_v27 = vadd.f32 %v1578_v20, %v185_v23  ;;  %v264_v28 = vsel %vm254_vm1, %v1581_v22, -inf }
  0xce   :  { %313 = vadd.xlane.f32.xlu0 %v312_v24  ;;  %v1297_v25 = vpop.f32.mrf.mxu0 }
  0xcf   :  { %v1591_v31 = vadd.f32 %v1297_v25, %v1578_v20  ;;  %v309_v33 = vsel %vm254_vm1, %v1586_v27, 0.0  ;;  %v261_v6 = vsel %vm254_vm1, %v1586_v27, -inf }
  0xd0   :  { %v195_v26 = vpop.f32.mrf.mxu0 }
  0xd1   :  { %v318_v37 = vsel %vm254_vm1, %v1591_v31, 0.0  ;;  %v1608_v40 = vadd.f32 %v1578_v20, %v195_v26  ;;  %v270_v42 = vsel %vm254_vm1, %v1591_v31, -inf }
  0xd2   :  { %265 = vmax.xlane.f32.xlu0 %v264_v28  ;;  %v1300_v29 = vpop.f32.mrf.mxu0 }
  0xd3   :  { %v315_v46 = vsel %vm254_vm1, %v1608_v40, 0.0  ;;  %v1625_v49 = vadd.f32 %v1300_v29, %v1578_v20  ;;  %v267_v51 = vsel %vm254_vm1, %v1608_v40, -inf }
  0xd4   :  { %v205_v30 = vpop.f32.mrf.mxu0 }
  0xd5   :  { %v1594_v32 = vadd.f32 %v1578_v20, %v205_v30  ;;  %v324_v53 = vsel %vm254_vm1, %v1625_v49, 0.0  ;;  %v276_v58 = vsel %vm254_vm1, %v1625_v49, -inf }
  0xd6   :  { %v1303_v34 = vpop.f32.mrf.mxu0  ;;  %310 = vadd.xlane.f32.xlu0 %v309_v33 }
  0xd7   :  { %v321_v35 = vsel %vm254_vm1, %v1594_v32, 0.0  ;;  %v273_v61 = vsel %vm254_vm1, %v1594_v32, -inf  ;;  %v1656_v0 = vadd.f32 %v1303_v34, %v1578_v20 }
  0xd8   :  { %v1600_v36 = vpop.f32.mrf.mxu0  ;;  %322 = vadd.xlane.f32.xlu1 %v321_v35 }
  0xd9   :  { %v330_v2 = vsel %vm254_vm1, %v1656_v0, 0.0  ;;  %v1685_v13 = vadd.f32 %v1578_v20, %v1600_v36  ;;  %v282_v18 = vsel %vm254_vm1, %v1656_v0, -inf }
  0xda   :  { %v1306_v38 = vpop.f32.mrf.mxu0  ;;  %319 = vadd.xlane.f32.xlu0 %v318_v37 }
  0xdb   :  { %v1605_v39 = vadd.f32 %v1306_v38, %v1578_v20  ;;  %v327_v17 = vsel %vm254_vm1, %v1685_v13, 0.0  ;;  %v279_v19 = vsel %vm254_vm1, %v1685_v13, -inf }
  0xdc   :  { %v225_v43 = vpop.f32.mrf.mxu0 }
  0xdd   :  { %v336_v41 = vsel %vm254_vm1, %v1605_v39, 0.0  ;;  %v1615_v44 = vadd.f32 %v1578_v20, %v225_v43  ;;  %v288_v45 = vsel %vm254_vm1, %v1605_v39, -inf }
  0xde   :  { %337 = vadd.xlane.f32.xlu1 %v336_v41  ;;  %271 = vmax.xlane.f32.xlu0 %v270_v42  ;;  %v1309_v47 = vpop.f32.mrf.mxu0 }
  0xdf   :  { %v1622_v48 = vadd.f32 %v1309_v47, %v1578_v20  ;;  %v333_v50 = vsel %vm254_vm1, %v1615_v44, 0.0  ;;  %v285_v5 = vsel %vm254_vm1, %v1615_v44, -inf }
  0xe0   :  { %v235_v54 = vpop.f32.mrf.mxu0 }
  0xe1   :  { %v342_v52 = vsel %vm254_vm1, %v1622_v48, 0.0  ;;  %v1636_v56 = vadd.f32 %v1578_v20, %v235_v54  ;;  %v294_v57 = vsel %vm254_vm1, %v1622_v48, -inf }
  0xe2   :  { %289 = vmax.xlane.f32.xlu1 %v288_v45  ;;  %316 = vadd.xlane.f32.xlu0 %v315_v46  ;;  %v1312_v55 = vpop.f32.mrf.mxu0 }
  0xe3   :  { %v1643_v59 = vadd.f32 %v1312_v55, %v1578_v20  ;;  %v339_v60 = vsel %vm254_vm1, %v1636_v56, 0.0  ;;  %v291_v1 = vsel %vm254_vm1, %v1636_v56, -inf }
  0xe4   :  { %v245_v7 = vpop.f32.mrf.mxu0 }
  0xe5   :  { %v348_v62 = vsel %vm254_vm1, %v1643_v59, 0.0  ;;  %v300_v8 = vsel %vm254_vm1, %v1643_v59, -inf  ;;  %v1675_v9 = vadd.f32 %v1578_v20, %v245_v7  ;;  %v395_v20 = vld [vmem:[%s2100_s4] sm:$0xf] }
  0xe6   :  { %334 = vadd.xlane.f32.xlu1 %v333_v50  ;;  %268 = vmax.xlane.f32.xlu0 %v267_v51 }
  0xe7   :  { %v345_v11 = vsel %vm254_vm1, %v1675_v9, 0.0  ;;  %v297_v14 = vsel %vm254_vm1, %v1675_v9, -inf }
  0xea   :  { %343 = vadd.xlane.f32.xlu1 %v342_v52  ;;  %325 = vadd.xlane.f32.xlu0 %v324_v53 }
  0xee   :  { %295 = vmax.xlane.f32.xlu1 %v294_v57  ;;  %277 = vmax.xlane.f32.xlu0 %v276_v58 }
  0xf2   :  { %340 = vadd.xlane.f32.xlu1 %v339_v60  ;;  %274 = vmax.xlane.f32.xlu0 %v273_v61 }
  0xf6   :  { %292 = vmax.xlane.f32.xlu1 %v291_v1  ;;  %349 = vadd.xlane.f32.xlu0 %v348_v62 }
  0xfa   :  { %331 = vadd.xlane.f32.xlu1 %v330_v2  ;;  %307 = vadd.xlane.f32.xlu0 %v306_v3 }
  0xfe   :  { %286 = vmax.xlane.f32.xlu1 %v285_v5  ;;  %262 = vmax.xlane.f32.xlu0 %v261_v6 }
 0x102   :  { %301 = vmax.xlane.f32.xlu1 %v300_v8  ;;  %304 = vadd.xlane.f32.xlu0 %v303_v10 }
 0x106   :  { %346 = vadd.xlane.f32.xlu1 %v345_v11  ;;  %259 = vmax.xlane.f32.xlu0 %v258_v12 }
 0x10a   :  { %298 = vmax.xlane.f32.xlu1 %v297_v14  ;;  %256 = vmax.xlane.f32.xlu0 %v255_v15 }
 0x10e   :  { %328 = vadd.xlane.f32.xlu1 %v327_v17 }
 0x112   :  { %283 = vmax.xlane.f32.xlu1 %v282_v18 }
 0x116   :  { %280 = vmax.xlane.f32.xlu1 %v279_v19 }
 0x120   :  { %398 = vperm.xlu0 %1352, %v395_v20  }
 0x157   :  { %v314_v23 = vpop.xlane.xlu0 %313 }
 0x158   :  { %v354_v11 = vmul.f32 0.03125, %v314_v23 }
 0x15b   :  { %v266_v24 = vpop.xlane.xlu0 %265 }
 0x15f   :  { %v311_v25 = vpop.xlane.xlu0 %310 }
 0x161   :  { %v323_v26 = vpop.xlane.xlu1 %322 }
 0x162   :  { %v357_v3 = vmul.f32 0.03125, %v323_v26 }
 0x163   :  { %v320_v28 = vpop.xlane.xlu0 %319 }
 0x164   :  { %v356_v1 = vmul.f32 0.03125, %v320_v28  ;;  %v353_v28 = vmul.f32 0.03125, %v311_v25 }
 0x167   :  { %v338_v29 = vpop.xlane.xlu1 %337  ;;  %v272_v30 = vpop.xlane.xlu0 %271 }
 0x168   :  { %v362_v6 = vmul.f32 0.03125, %v338_v29 }
 0x16a   :  { %v371_v26 = vsel %vm367_vm3, %v354_v11, %v362_v6 }
 0x16b   :  { %v1702_v33 = vpop.xlane.xlu1 %289  ;;  %v317_v34 = vpop.xlane.xlu0 %316 }
 0x16c   :  { %v355_v7 = vmul.f32 0.03125, %v317_v34 }
 0x16f   :  { %v335_v35 = vpop.xlane.xlu1 %334  ;;  %v269_v36 = vpop.xlane.xlu0 %268 }
 0x170   :  { %v361_v17 = vmul.f32 0.03125, %v335_v35 }
 0x172   :  { %v370_v34 = vsel %vm367_vm3, %v353_v28, %v361_v17  ;;  %v480_v17 = vld [vmem:[%s2101_s5 + $0x20] sm:$0xff] }
 0x173   :  { %v344_v37 = vpop.xlane.xlu1 %343  ;;  %v326_v38 = vpop.xlane.xlu0 %325 }
 0x174   :  { %v358_v52 = vmul.f32 0.03125, %v326_v38  ;;  %v364_v60 = vmul.f32 0.03125, %v344_v37  ;;  %v380_v37 = vsel %vm376_vm4, %v371_v26, %v266_v24 }
 0x176   :  { %v373_v10 = vsel %vm367_vm3, %v356_v1, %v364_v60  ;;  %v484_v60 = vld [vmem:[%s2102_s6] sm:$0xff] }
 0x177   :  { %v296_v41 = vpop.xlane.xlu1 %295  ;;  %v278_v42 = vpop.xlane.xlu0 %277  ;;  %v382_v20 = vsel %vm376_vm4, %v373_v10, %v272_v30  ;;  %494 = vperm.xlu1 %1353, %v484_v60   ;;  %v488_v1 = vld [vmem:[%s2102_s6 + $0x20] sm:$0xff] }
 0x178   :  { %v391_v23 = vsel %vm385_vm5, %v382_v20, %v296_v41  ;;  %v389_v41 = vsel %vm385_vm5, %v380_v37, %v1702_v33  ;;  %v483_v20 = vld [vmem:[%s2101_s5 + $0x38] sm:$0xff] }
 0x17b   :  { %v341_v43 = vpop.xlane.xlu1 %340  ;;  %v275_v45 = vpop.xlane.xlu0 %274 }
 0x17c   :  { %v363_v2 = vmul.f32 0.03125, %v341_v43 }
 0x17e   :  { %v372_v15 = vsel %vm367_vm3, %v355_v7, %v363_v2  ;;  %v489_v2 = vld [vmem:[%s2102_s6 + $0x28] sm:$0xff] }
 0x17f   :  { %v293_v46 = vpop.xlane.xlu1 %292  ;;  %v350_v47 = vpop.xlane.xlu0 %349  ;;  %v381_v29 = vsel %vm376_vm4, %v372_v15, %v269_v36  ;;  %v479_v15 = vld [vmem:[%s2101_s5 + $0x18] sm:$0xff] }
 0x180   :  { %v366_v51 = vmul.f32 0.03125, %v350_v47  ;;  %v390_v25 = vsel %vm385_vm5, %v381_v29, %v293_v46 }
 0x182   :  { %v375_v55 = vsel %vm367_vm3, %v358_v52, %v366_v51 }
 0x183   :  { %v332_v50 = vpop.xlane.xlu1 %331  ;;  %v308_v53 = vpop.xlane.xlu0 %307  ;;  %v384_v58 = vsel %vm376_vm4, %v375_v55, %v278_v42 }
 0x184   :  { %v360_v38 = vmul.f32 0.03125, %v332_v50  ;;  %v352_v30 = vmul.f32 0.03125, %v308_v53 }
 0x186   :  { %v369_v24 = vsel %vm367_vm3, %v352_v30, %v360_v38 }
 0x187   :  { %v287_v54 = vpop.xlane.xlu1 %286  ;;  %v263_v61 = vpop.xlane.xlu0 %262 }
 0x188   :  { %v379_v36 = vsel %vm376_vm4, %v370_v34, %v263_v61  ;;  %v486_v61 = vld [vmem:[%s2102_s6 + $0x10] sm:$0xff] }
 0x189   :  { %v388_v50 = vsel %vm385_vm5, %v379_v36, %v287_v54 }
 0x18b   :  { %v302_v57 = vpop.xlane.xlu1 %301  ;;  %v305_v12 = vpop.xlane.xlu0 %304 }
 0x18c   :  { %v393_v62 = vsel %vm385_vm5, %v384_v58, %v302_v57  ;;  %v394_v57 = vld [vmem:[%s2099_s3] sm:$0xf] }
 0x18d   :  { %1314 = vmatpush3.msra.mxu1 %v393_v62  ;;  %v476_v58 = vld [vmem:[%s2101_s5] sm:$0xff]  ;;  %v487_v62 = vld [vmem:[%s2102_s6 + $0x18] sm:$0xff] }
 0x18e   :  { %1315 = vmatprep.subr.mxu1 %v1440_v16 }
 0x18f   :  { %v347_v5 = vpop.xlane.xlu1 %346  ;;  %v260_v42 = vpop.xlane.xlu0 %259 }
 0x190   :  { %v365_v8 = vmul.f32 0.03125, %v347_v5  ;;  %v378_v46 = vsel %vm376_vm4, %v369_v24, %v260_v42  ;;  %v491_v5 = vld [vmem:[%s2102_s6 + $0x38] sm:$0xff] }
 0x192   :  { %v374_v14 = vsel %vm367_vm3, %v357_v3, %v365_v8  ;;  %v490_v3 = vld [vmem:[%s2102_s6 + $0x30] sm:$0xff] }
 0x193   :  { %v299_v18 = vpop.xlane.xlu1 %298  ;;  %v383_v19 = vsel %vm376_vm4, %v374_v14, %v275_v45  ;;  %v351_v45 = vmul.f32 0.03125, %v305_v12  ;;  %v257_v52 = vpop.xlane.xlu0 %256  ;;  %v477_v12 = vld [vmem:[%s2101_s5 + $0x8] sm:$0xff]  ;;  %v478_v14 = vld [vmem:[%s2101_s5 + $0x10] sm:$0xff] }
 0x194   :  { %v392_v21 = vsel %vm385_vm5, %v383_v19, %v299_v18  ;;  %v481_v18 = vld [vmem:[%s2101_s5 + $0x28] sm:$0xff]  ;;  %v482_v19 = vld [vmem:[%s2101_s5 + $0x30] sm:$0xff]  ;;  %s1444_s5 = smov 127  }
 0x195   :  { %1316 = vmatpush3.msra.mxu1 %v392_v21 }
 0x196   :  { %1317 = vmatprep.subr.mxu1 %v1440_v16 }
 0x197   :  { %v329_v35 = vpop.xlane.xlu1 %328  ;;  %1318 = vmatpush3.msra.mxu1 %v391_v23 }
 0x198   :  { %v359_v43 = vmul.f32 0.03125, %v329_v35  ;;  %1319 = vmatprep.subr.mxu1 %v1440_v16 }
 0x199   :  { %1320 = vmatpush3.msra.mxu1 %v390_v25 }
 0x19a   :  { %1321 = vmatprep.subr.mxu1 %v1440_v16  ;;  %v368_v51 = vsel %vm367_vm3, %v351_v45, %v359_v43 }
 0x19b   :  { %v284_v47 = vpop.xlane.xlu1 %283  ;;  %1322 = vmatpush3.msra.mxu1 %v389_v41  ;;  %v377_v33 = vsel %vm376_vm4, %v368_v51, %v257_v52  ;;  %v399_v6 = vpop.permute.xlu0 %398 }
 0x19c   :  { %1323 = vmatprep.subr.mxu1 %v1440_v16  ;;  %v387_v53 = vsel %vm385_vm5, %v378_v46, %v284_v47 }
 0x19d   :  { %1324 = vmatpush3.msra.mxu1 %v388_v50 }
 0x19e   :  { %1325 = vmatprep.subr.mxu1 %v1440_v16 }
 0x19f   :  { %v281_v55 = vpop.xlane.xlu1 %280  ;;  %1326 = vmatpush3.msra.mxu1 %v387_v53 }
 0x1a0   :  { %1327 = vmatprep.subr.mxu1 %v1440_v16  ;;  %v386_v54 = vsel %vm385_vm5, %v377_v33, %v281_v55  ;;  %v485_v16 = vld [vmem:[%s2102_s6 + $0x8] sm:$0xff] }
 0x1a1   :  { %1328 = vmatpush3.msra.mxu1 %v386_v54  ;;  %499 = vperm.xlu1 %1353, %v485_v16  }
 0x1a2   :  { %1330 = vmatmul.mubr.msk.f32.vlgmr.msra.gmra.mxu1 %vm401_vm6, %v394_v57 }
 0x1a3   :  { %1334 = vmatprep.mubr.msk.f32.mxu1 %vm532_vm7, %v476_v58 }
 0x1a5   :  { %504 = vperm.xlu1 %1353, %v486_v61  }
 0x1a9   :  { %509 = vperm.xlu1 %1353, %v487_v62  }
 0x1ad   :  { %514 = vperm.xlu1 %1353, %v488_v1  }
 0x1b1   :  { %519 = vperm.xlu1 %1353, %v489_v2  }
 0x1b5   :  { %524 = vperm.xlu1 %1353, %v490_v3  }
 0x1b9   :  { %529 = vperm.xlu1 %1353, %v491_v5  }
 0x1f2   :  { %v495_v21 = vpop.permute.xlu1 %494 }
 0x21c   :  { %v500_v26 = vpop.permute.xlu1 %499 }
 0x220   :  { %v505_v28 = vpop.permute.xlu1 %504 }
 0x224   :  { %v510_v29 = vpop.permute.xlu1 %509 }
 0x228   :  { %v515_v23 = vpop.permute.xlu1 %514 }
 0x22c   :  { %v520_v34 = vpop.permute.xlu1 %519 }
 0x230   :  { %v525_v25 = vpop.permute.xlu1 %524 }
 0x234   :  { %v530_v51 = vpop.permute.xlu1 %529 }
 0x262   :  { %v471_v7 = vpop.f32.mrf.mxu1 }
 0x263   :  { %v472_v8 = vadd.f32 %v471_v7, %v399_v6 }
 0x264   :  { %v1331_v10 = vpop.f32.mrf.mxu1 }
 0x265   :  { %v475_v11 = vmax.f32 %v472_v8, 0.0 }
 0x267   :  { %1332 = vmatprep.subr.msk.mxu1 %vm557_vm8, %v475_v11 }
 0x268   :  { %1333 = vmatpush3.msk.msra.mxu1 %vm557_vm8, %v475_v11 }
 0x269   :  { %1335 = vmatmul.mubr.msk.f32.vlgmr.msra.gmra.mxu1 %vm532_vm7, %v477_v12 }
 0x26a   :  { %1337 = vmatprep.mubr.msk.f32.mxu1 %vm532_vm7, %v478_v14 }
 0x26d   :  { %1338 = vmatmul.mubr.msk.f32.gmra.mxu1 %vm532_vm7, %v479_v15 }
 0x26e   :  { %1340 = vmatprep.mubr.msk.f32.mxu1 %vm532_vm7, %v480_v17 }
 0x271   :  { %1341 = vmatmul.mubr.msk.f32.gmra.mxu1 %vm532_vm7, %v481_v18 }
 0x272   :  { %1343 = vmatprep.mubr.msk.f32.mxu1 %vm532_vm7, %v482_v19 }
 0x275   :  { %1344 = vmatmul.mubr.msk.f32.gmra.mxu1 %vm532_vm7, %v483_v20 }
 0x329   :  { %v1336_v35 = vpop.f32.mrf.mxu1 }
 0x32a   :  { %v633_v37 = vadd.f32 %v1336_v35, %v500_v26 }
 0x32b   :  { %v627_v38 = vpop.f32.mrf.mxu1 }
 0x32c   :  { %v628_v30 = vadd.f32 %v627_v38, %v495_v21  ;;  %676 = vrot.lane.b32.xlu1 %v633_v37, %s1443_s15 }
 0x32d   :  { %v1339_v42 = vpop.f32.mrf.mxu1 }
 0x32e   :  { %v643_v43 = vadd.f32 %v1339_v42, %v510_v29  ;;  %674 = vrot.lane.b32.xlu0 %v628_v30, %s1443_s15 }
 0x32f   :  { %v637_v36 = vpop.f32.mrf.mxu1 }
 0x330   :  { %v638_v45 = vadd.f32 %v637_v36, %v505_v28  ;;  %680 = vrot.lane.b32.xlu1 %v643_v43, %s1443_s15 }
 0x331   :  { %v1342_v41 = vpop.f32.mrf.mxu1 }
 0x332   :  { %v653_v47 = vadd.f32 %v1342_v41, %v520_v34  ;;  %678 = vrot.lane.b32.xlu0 %v638_v45, %s1443_s15 }
 0x333   :  { %v647_v24 = vpop.f32.mrf.mxu1 }
 0x334   :  { %v648_v50 = vadd.f32 %v647_v24, %v515_v23  ;;  %684 = vrot.lane.b32.xlu1 %v653_v47, %s1443_s15 }
 0x335   :  { %v1345_v46 = vpop.f32.mrf.mxu1 }
 0x336   :  { %v663_v52 = vadd.f32 %v1345_v46, %v530_v51  ;;  %682 = vrot.lane.b32.xlu0 %v648_v50, %s1443_s15 }
 0x337   :  { %v657_v53 = vpop.f32.mrf.mxu1 }
 0x338   :  { %v658_v55 = vadd.f32 %v657_v53, %v525_v25  ;;  %688 = vrot.lane.b32.xlu1 %v663_v52, %s1443_s15 }
 0x33a   :  { %686 = vrot.lane.b32.xlu0 %v658_v55, %s1443_s15 }
 0x39e   :  { %v677_v33 = vpop.permute.xlu1 %676 }
 0x39f   :  { %v699_v57 = vadd.f32 %v677_v33, %v633_v37 }
 0x3a0   :  { %v675_v54 = vpop.permute.xlu0 %674 }
 0x3a1   :  { %v1240_v58 = vmul.f32 -1.442695, %v699_v57  ;;  %v698_v60 = vadd.f32 %v675_v54, %v628_v30 }
 0x3a2   :  { %v681_v16 = vpop.permute.xlu1 %680 }
 0x3a3   :  { %1354 = vpow2.f32 %v1240_v58  ;;  %v1239_v61 = vmul.f32 -1.442695, %v698_v60  ;;  %v701_v62 = vadd.f32 %v681_v16, %v643_v43 }
 0x3a4   :  { %v679_v1 = vpop.permute.xlu0 %678 }
 0x3a5   :  { %1356 = vpow2.f32 %v1239_v61  ;;  %v700_v2 = vadd.f32 %v679_v1, %v638_v45  ;;  %v1242_v3 = vmul.f32 -1.442695, %v701_v62 }
 0x3a6   :  { %v685_v10 = vpop.permute.xlu1 %684 }
 0x3a7   :  { %v1241_v5 = vmul.f32 -1.442695, %v700_v2  ;;  %v703_v14 = vadd.f32 %v685_v10, %v653_v47 }
 0x3a8   :  { %v683_v6 = vpop.permute.xlu0 %682 }
 0x3a9   :  { %1358 = vpow2.f32 %v1241_v5  ;;  %v702_v7 = vadd.f32 %v683_v6, %v648_v50  ;;  %v1244_v21 = vmul.f32 -1.442695, %v703_v14 }
 0x3aa   :  { %1360 = vpow2.f32 %v1242_v3  ;;  %v689_v23 = vpop.permute.xlu1 %688 }
 0x3ab   :  { %v1243_v8 = vmul.f32 -1.442695, %v702_v7  ;;  %v705_v38 = vadd.f32 %v689_v23, %v663_v52 }
 0x3ac   :  { %v687_v11 = vpop.permute.xlu0 %686 }
 0x3ad   :  { %1362 = vpow2.f32 %v1243_v8  ;;  %v704_v12 = vadd.f32 %v687_v11, %v658_v55  ;;  %v1246_v42 = vmul.f32 -1.442695, %v705_v38 }
 0x3af   :  { %v1245_v15 = vmul.f32 -1.442695, %v704_v12 }
 0x3b0   :  { %v1355_v17 = vpop.eup %1354 }
 0x3b1   :  { %v731_v18 = vadd.f32 1.0, %v1355_v17  ;;  %1364 = vpow2.f32 %v1245_v15 }
 0x3b2   :  { %v1357_v19 = vpop.eup %1356 }
 0x3b3   :  { %1366 = vrcp.f32 %v731_v18  ;;  %v730_v20 = vadd.f32 1.0, %v1357_v19 }
 0x3b5   :  { %1368 = vrcp.f32 %v730_v20 }
 0x3b6   :  { %v1359_v26 = vpop.eup %1358  ;;  %1370 = vpow2.f32 %v1244_v21 }
 0x3b7   :  { %v732_v28 = vadd.f32 1.0, %v1359_v26  ;;  %v1361_v29 = vpop.eup %1360 }
 0x3b8   :  { %v733_v35 = vadd.f32 1.0, %v1361_v29 }
 0x3b9   :  { %1372 = vrcp.f32 %v732_v28 }
 0x3ba   :  { %v1363_v34 = vpop.eup %1362 }
 0x3bb   :  { %v734_v37 = vadd.f32 1.0, %v1363_v34 }
 0x3bd   :  { %1374 = vrcp.f32 %v734_v37 }
 0x3be   :  { %v1365_v30 = vpop.eup %1364  ;;  %1376 = vrcp.f32 %v733_v35 }
 0x3bf   :  { %v736_v43 = vadd.f32 1.0, %v1365_v30 }
 0x3c0   :  { %v1367_v25 = vpop.eup %1366 }
 0x3c1   :  { %1378 = vrcp.f32 %v736_v43  ;;  %798 = vrot.lane.b32.xlu1 %v1367_v25, %s1444_s5 }
 0x3c2   :  { %v1369_v36 = vpop.eup %1368  ;;  %1380 = vpow2.f32 %v1246_v42 }
 0x3c3   :  { %796 = vrot.lane.b32.xlu0 %v1369_v36, %s1444_s5  ;;  %v1371_v45 = vpop.eup %1370 }
 0x3c4   :  { %v735_v47 = vadd.f32 1.0, %v1371_v45 }
 0x3c5   :  { %817 = vperm.xlu1 %1353, %v1367_v25  }
 0x3c6   :  { %v1373_v41 = vpop.eup %1372  ;;  %1382 = vrcp.f32 %v735_v47 }
 0x3c7   :  { %800 = vrot.lane.b32.xlu0 %v1373_v41, %s1444_s5 }
 0x3c9   :  { %813 = vperm.xlu1 %1353, %v1369_v36  }
 0x3ca   :  { %v1375_v24 = vpop.eup %1374 }
 0x3cb   :  { %804 = vrot.lane.b32.xlu0 %v1375_v24, %s1444_s5  ;;  %v1377_v50 = vpop.eup %1376 }
 0x3cd   :  { %802 = vrot.lane.b32.xlu1 %v1377_v50, %s1444_s5 }
 0x3ce   :  { %v1379_v51 = vpop.eup %1378 }
 0x3cf   :  { %808 = vrot.lane.b32.xlu0 %v1379_v51, %s1444_s5  ;;  %v1381_v46 = vpop.eup %1380 }
 0x3d0   :  { %v737_v52 = vadd.f32 1.0, %v1381_v46 }
 0x3d1   :  { %825 = vperm.xlu1 %1353, %v1377_v50  }
 0x3d2   :  { %1384 = vrcp.f32 %v737_v52 }
 0x3d3   :  { %v1383_v53 = vpop.eup %1382 }
 0x3d5   :  { %821 = vperm.xlu1 %1353, %v1373_v41  }
 0x3d9   :  { %806 = vrot.lane.b32.xlu1 %v1383_v53, %s1444_s5 }
 0x3dd   :  { %833 = vperm.xlu1 %1353, %v1383_v53  }
 0x3df   :  { %v1385_v55 = vpop.eup %1384 }
 0x3e1   :  { %829 = vperm.xlu1 %1353, %v1375_v24  }
 0x3e5   :  { %810 = vrot.lane.b32.xlu1 %v1385_v55, %s1444_s5 }
 0x3e9   :  { %841 = vperm.xlu1 %1353, %v1385_v55  }
 0x3ed   :  { %837 = vperm.xlu1 %1353, %v1379_v51   ;;  %754 = vxpose.xlu0.b32.start [1/8] (short) (narrow) %v1369_v36, 8 }
 0x3f1   :  { %755 = vxpose.xlu0.b32.cont [2/8] (short) (narrow) %v1367_v25, 8 }
 0x3f5   :  { %756 = vxpose.xlu0.b32.cont [3/8] (short) (narrow) %v1373_v41, 8 }
 0x3f9   :  { %757 = vxpose.xlu0.b32.cont [4/8] (short) (narrow) %v1377_v50, 8 }
 0x3fd   :  { %758 = vxpose.xlu0.b32.cont [5/8] (short) (narrow) %v1375_v24, 8 }
 0x401   :  { %759 = vxpose.xlu0.b32.cont [6/8] (short) (narrow) %v1383_v53, 8 }
 0x405   :  { %760 = vxpose.xlu0.b32.cont [7/8] (short) (narrow) %v1379_v51, 8 }
 0x409   :  { %761 = vxpose.xlu0.b32.end [8/8] (short) (narrow) %v1385_v55, 8 }
 0x433   :  { %v799_v33 = vpop.permute.xlu1 %798 }
 0x434   :  { %849 = vperm.xlu1 %1353, %v799_v33  }
 0x435   :  { %v797_v57 = vpop.permute.xlu0 %796 }
 0x438   :  { %845 = vperm.xlu1 %1353, %v797_v57  }
 0x439   :  { %v801_v16 = vpop.permute.xlu0 %800 }
 0x43d   :  { %v805_v2 = vpop.permute.xlu0 %804 }
 0x440   :  { %v818_v54 = vpop.permute.xlu1 %817 }
 0x441   :  { %v809_v7 = vpop.permute.xlu0 %808  ;;  %v1796_v10 = vmul.f32 %v818_v54, %v1653_v63 }
 0x443   :  { %v941_v11 = vmul.f32 %v1796_v10, %v1796_v10  ;;  %v895_v12 = vsel %vm254_vm1, %v1796_v10, 0.0 }
 0x444   :  { %v814_v58 = vpop.permute.xlu1 %813 }
 0x445   :  { %v959_v17 = vsel %vm254_vm1, %v941_v11, 0.0 }
 0x448   :  { %v803_v60 = vpop.permute.xlu1 %802 }
 0x449   :  { %857 = vperm.xlu1 %1353, %v803_v60  }
 0x44c   :  { %v826_v61 = vpop.permute.xlu1 %825 }
 0x44d   :  { %853 = vperm.xlu1 %1353, %v801_v16   ;;  %v1803_v14 = vmul.f32 %v826_v61, %v1581_v22 }
 0x44f   :  { %v943_v19 = vmul.f32 %v1803_v14, %v1803_v14  ;;  %v901_v30 = vsel %vm254_vm1, %v1803_v14, 0.0 }
 0x450   :  { %v822_v62 = vpop.permute.xlu1 %821 }
 0x451   :  { %v1806_v15 = vmul.f32 %v822_v62, %v1586_v27  ;;  %v965_v27 = vsel %vm254_vm1, %v943_v19, 0.0 }
 0x453   :  { %v898_v63 = vsel %vm254_vm1, %v1806_v15, 0.0  ;;  %v942_v43 = vmul.f32 %v1806_v15, %v1806_v15 }
 0x454   :  { %v807_v1 = vpop.permute.xlu1 %806 }
 0x455   :  { %865 = vperm.xlu1 %1353, %v807_v1   ;;  %v962_v45 = vsel %vm254_vm1, %v942_v43, 0.0 }
 0x458   :  { %v834_v3 = vpop.permute.xlu1 %833 }
 0x459   :  { %861 = vperm.xlu1 %1353, %v805_v2   ;;  %v1810_v18 = vmul.f32 %v834_v3, %v1591_v31 }
 0x45b   :  { %v945_v21 = vmul.f32 %v1810_v18, %v1810_v18  ;;  %v907_v42 = vsel %vm254_vm1, %v1810_v18, 0.0 }
 0x45c   :  { %v830_v5 = vpop.permute.xlu1 %829 }
 0x45d   :  { %v971_v31 = vsel %vm254_vm1, %v945_v21, 0.0  ;;  %v1847_v36 = vmul.f32 %v830_v5, %v1608_v40 }
 0x45f   :  { %v904_v24 = vsel %vm254_vm1, %v1847_v36, 0.0  ;;  %v944_v46 = vmul.f32 %v1847_v36, %v1847_v36 }
 0x460   :  { %v811_v6 = vpop.permute.xlu1 %810 }
 0x461   :  { %873 = vperm.xlu0 %1352, %v811_v6   ;;  %v968_v55 = vsel %vm254_vm1, %v944_v46, 0.0 }
 0x464   :  { %v842_v20 = vpop.permute.xlu1 %841 }
 0x465   :  { %v1817_v22 = vmul.f32 %v842_v20, %v1625_v49  ;;  %v1827_v49 = vmul.f32 %v814_v58, %v1666_v4 }
 0x467   :  { %v947_v26 = vmul.f32 %v1817_v22, %v1817_v22  ;;  %v892_v35 = vsel %vm254_vm1, %v1827_v49, 0.0  ;;  %v940_v4 = vmul.f32 %v1827_v49, %v1827_v49  ;;  %v913_v40 = vsel %vm254_vm1, %v1817_v22, 0.0 }
 0x468   :  { %v838_v29 = vpop.permute.xlu1 %837 }
 0x469   :  { %v770_v8 = vpop.trf.xlu0  ;;  %v977_v28 = vsel %vm254_vm1, %v947_v26, 0.0  ;;  %v1865_v53 = vmul.f32 %v838_v29, %v1594_v32 }
 0x46a   :  { %787 = vst.msk [vmem:[#allocation2] sm:$0x3] %vm786_vm9, %v770_v8 }
 0x46b   :  { %v910_v54 = vsel %vm254_vm1, %v1865_v53, 0.0  ;;  %v946_v58 = vmul.f32 %v1865_v53, %v1865_v53 }
 0x46d   :  { %v974_v16 = vsel %vm254_vm1, %v946_v58, 0.0 }
 0x47d   :  { %896 = vadd.xlane.f32.xlu1 %v895_v12 }
 0x480   :  { %960 = vadd.xlane.f32.xlu0 %v959_v17 }
 0x484   :  { %899 = vadd.xlane.f32.xlu0 %v898_v63 }
 0x488   :  { %966 = vadd.xlane.f32.xlu0 %v965_v27 }
 0x48c   :  { %972 = vadd.xlane.f32.xlu0 %v971_v31 }
 0x48e   :  { %869 = vperm.xlu1 %1353, %v809_v7  }
 0x490   :  { %978 = vadd.xlane.f32.xlu0 %v977_v28 }
 0x4af   :  { %v850_v23 = vpop.permute.xlu1 %849 }
 0x4b0   :  { %v1830_v34 = vmul.f32 %v850_v23, %v1656_v0  ;;  %v956_v0 = vsel %vm254_vm1, %v940_v4, 0.0 }
 0x4b2   :  { %893 = vadd.xlane.f32.xlu1 %v892_v35  ;;  %v949_v37 = vmul.f32 %v1830_v34, %v1830_v34  ;;  %v919_v62 = vsel %vm254_vm1, %v1830_v34, 0.0 }
 0x4b3   :  { %v846_v25 = vpop.permute.xlu1 %845 }
 0x4b4   :  { %v983_v38 = vsel %vm254_vm1, %v949_v37, 0.0  ;;  %v1882_v61 = vmul.f32 %v846_v25, %v1685_v13  ;;  %v1932_v25 = vld [vmem:[%s2104_s8] ss:$0 sm:$0xff] }
 0x4b5   :  { %984 = vadd.xlane.f32.xlu0 %v983_v38 }
 0x4b6   :  { %902 = vadd.xlane.f32.xlu1 %v901_v30  ;;  %v916_v3 = vsel %vm254_vm1, %v1882_v61, 0.0  ;;  %v948_v5 = vmul.f32 %v1882_v61, %v1882_v61 }
 0x4ba   :  { %957 = vadd.xlane.f32.xlu1 %v956_v0 }
 0x4be   :  { %908 = vadd.xlane.f32.xlu1 %v907_v42 }
 0x4c2   :  { %963 = vadd.xlane.f32.xlu1 %v962_v45 }
 0x4c4   :  { %v858_v41 = vpop.permute.xlu1 %857 }
 0x4c5   :  { %v1851_v47 = vmul.f32 %v858_v41, %v1605_v39 }
 0x4c6   :  { %905 = vadd.xlane.f32.xlu1 %v904_v24 }
 0x4c7   :  { %v925_v50 = vsel %vm254_vm1, %v1851_v47, 0.0  ;;  %v951_v51 = vmul.f32 %v1851_v47, %v1851_v47 }
 0x4c8   :  { %926 = vadd.xlane.f32.xlu0 %v925_v50  ;;  %v854_v52 = vpop.permute.xlu1 %853 }
 0x4c9   :  { %v989_v39 = vsel %vm254_vm1, %v951_v51, 0.0  ;;  %v1898_v7 = vmul.f32 %v854_v52, %v1615_v44 }
 0x4ca   :  { %914 = vadd.xlane.f32.xlu1 %v913_v40 }
 0x4cb   :  { %v922_v11 = vsel %vm254_vm1, %v1898_v7, 0.0  ;;  %v950_v12 = vmul.f32 %v1898_v7, %v1898_v7 }
 0x4cc   :  { %990 = vadd.xlane.f32.xlu0 %v989_v39 }
 0x4cd   :  { %v986_v44 = vsel %vm254_vm1, %v950_v12, 0.0 }
 0x4ce   :  { %969 = vadd.xlane.f32.xlu1 %v968_v55 }
 0x4d0   :  { %v866_v33 = vpop.permute.xlu1 %865 }
 0x4d1   :  { %v1869_v57 = vmul.f32 %v866_v33, %v1622_v48 }
 0x4d2   :  { %911 = vadd.xlane.f32.xlu1 %v910_v54 }
 0x4d3   :  { %v931_v60 = vsel %vm254_vm1, %v1869_v57, 0.0  ;;  %v953_v32 = vmul.f32 %v1869_v57, %v1869_v57 }
 0x4d4   :  { %932 = vadd.xlane.f32.xlu0 %v931_v60  ;;  %v862_v17 = vpop.permute.xlu1 %861 }
 0x4d5   :  { %v995_v48 = vsel %vm254_vm1, %v953_v32, 0.0  ;;  %v1907_v63 = vmul.f32 %v862_v17, %v1636_v56 }
 0x4d6   :  { %975 = vadd.xlane.f32.xlu1 %v974_v16 }
 0x4d7   :  { %v928_v19 = vsel %vm254_vm1, %v1907_v63, 0.0  ;;  %v952_v20 = vmul.f32 %v1907_v63, %v1907_v63 }
 0x4d8   :  { %996 = vadd.xlane.f32.xlu0 %v995_v48 }
 0x4d9   :  { %v992_v27 = vsel %vm254_vm1, %v952_v20, 0.0 }
 0x4da   :  { %920 = vadd.xlane.f32.xlu1 %v919_v62 }
 0x4dc   :  { %v874_v1 = vpop.permute.xlu0 %873 }
 0x4dd   :  { %v1887_v2 = vmul.f32 %v874_v1, %v1643_v59  ;;  %v980_v59 = vsel %vm254_vm1, %v948_v5, 0.0 }
 0x4de   :  { %917 = vadd.xlane.f32.xlu1 %v916_v3 }
 0x4df   :  { %v937_v6 = vsel %vm254_vm1, %v1887_v2, 0.0  ;;  %v955_v13 = vmul.f32 %v1887_v2, %v1887_v2 }
 0x4e0   :  { %938 = vadd.xlane.f32.xlu0 %v937_v6 }
 0x4e1   :  { %v1001_v8 = vsel %vm254_vm1, %v955_v13, 0.0 }
 0x4e2   :  { %981 = vadd.xlane.f32.xlu1 %v980_v59 }
 0x4e4   :  { %1002 = vadd.xlane.f32.xlu0 %v1001_v8 }
 0x4e6   :  { %923 = vadd.xlane.f32.xlu1 %v922_v11 }
 0x4ea   :  { %987 = vadd.xlane.f32.xlu1 %v986_v44 }
 0x4ee   :  { %929 = vadd.xlane.f32.xlu1 %v928_v19 }
 0x4f2   :  { %993 = vadd.xlane.f32.xlu1 %v992_v27 }
 0x506   :  { %v897_v21 = vpop.xlane.xlu1 %896 }
 0x507   :  { %v1005_v31 = vmul.f32 0.03125, %v897_v21 }
 0x509   :  { %v1037_v26 = vmul.f32 %v1005_v31, %v1005_v31  ;;  %v961_v28 = vpop.xlane.xlu0 %960  ;;  %v1069_v0 = vsub.f32 %v1796_v10, %v1005_v31 }
 0x50a   :  { %v1021_v29 = vmul.f32 0.03125, %v961_v28  ;;  %v870_v56 = vpop.permute.xlu1 %869 }
 0x50b   :  { %v1916_v23 = vmul.f32 %v870_v56, %v1675_v9  ;;  %v1927_v9 = vld [vmem:[%s2103_s7] ss:$0 sm:$0xff]  ;;  %s1418_s7 = scalar_lea.vmem %s1201_s1, 32 }
 0x50c   :  { %v1053_v35 = vsub.f32 %v1021_v29, %v1037_v26  ;;  %p1419_p0 = scmp.ne.s32.totalorder %s1201_s1, %s1418_s7  ;;  %p1424_p2 = scmp.lt.s32.totalorder %s1418_s7, %s1418_s7 }
 0x50d   :  { %v934_v37 = vsel %vm254_vm1, %v1916_v23, 0.0  ;;  %v954_v38 = vmul.f32 %v1916_v23, %v1916_v23  ;;  %v900_v10 = vpop.xlane.xlu0 %899 }
 0x50e   :  { %v1085_v30 = vadd.f32 1e-05, %v1053_v35  ;;  %935 = vadd.xlane.f32.xlu1 %v934_v37  ;;  %p1425_p3 = por %p1424_p2, %p1423_p1 }
 0x50f   :  { %v998_v4 = vsel %vm254_vm1, %v954_v38, 0.0 }
 0x510   :  { %1386 = vrsqrt.f32 %v1085_v30  ;;  %p1426_p4 = pnand %p1425_p3, %p1419_p0 }
 0x512   :  { %999 = vadd.xlane.f32.xlu1 %v998_v4 }
 0x51d   :  { %v1387_v42 = vpop.eup %1386 }
 0x51e   :  { %v1117_v43 = vmul.f32 %v1387_v42, %v1069_v0 }
 0x520   :  { %v1140_v45 = vmul.f32 %v1927_v9, %v1117_v43 }
 0x522   :  { %v1163_v41 = vadd.f32 %v1932_v25, %v1140_v45 }
 0x524   :  { %1179 = vst.msk [vmem:[%s2106_s10 + $0x8] sm:$0xff] %vm254_vm1, %v1163_v41 }
 0x525   :  { %1429 = shalt.err (!%p1426_p4)
}
 0x526   :  { %1203 = dma.vmem_to_hbm [thread:$0]  %s1201_s1, 32, %s2105_s9, [#allocation3]   ;;  %v967_v50 = vpop.xlane.xlu0 %966  ;;  %v1943_v62 = vmul.f32 0.03125, %v900_v10 }
 0x527   :  { %v1023_v39 = vmul.f32 0.03125, %v967_v50 }
 0x528   :  { %v1038_v8 = vmul.f32 %v1943_v62, %v1943_v62 }
 0x52a   :  { %v973_v55 = vpop.xlane.xlu0 %972 }
 0x52b   :  { %v1025_v6 = vmul.f32 0.03125, %v973_v55 }
 0x52e   :  { %v979_v5 = vpop.xlane.xlu0 %978 }
 0x52f   :  { %v1027_v35 = vmul.f32 0.03125, %v979_v5 }
 0x53b   :  { %v894_v24 = vpop.xlane.xlu1 %893 }
 0x53c   :  { %v1004_v40 = vmul.f32 0.03125, %v894_v24 }
 0x53e   :  { %v1036_v54 = vmul.f32 %v1004_v40, %v1004_v40  ;;  %v1947_v17 = vpop.xlane.xlu0 %984  ;;  %v1068_v37 = vsub.f32 %v1827_v49, %v1004_v40 }
 0x53f   :  { %v903_v51 = vpop.xlane.xlu1 %902 }
 0x540   :  { %v1007_v46 = vmul.f32 0.03125, %v903_v51 }
 0x542   :  { %v1039_v52 = vmul.f32 %v1007_v46, %v1007_v46  ;;  %v1071_v28 = vsub.f32 %v1803_v14, %v1007_v46 }
 0x543   :  { %v958_v33 = vpop.xlane.xlu1 %957 }
 0x544   :  { %v1055_v58 = vsub.f32 %v1023_v39, %v1039_v52  ;;  %v1020_v60 = vmul.f32 0.03125, %v958_v33 }
 0x546   :  { %v1087_v32 = vadd.f32 1e-05, %v1055_v58  ;;  %v1052_v16 = vsub.f32 %v1020_v60, %v1036_v54 }
 0x547   :  { %v909_v48 = vpop.xlane.xlu1 %908 }
 0x548   :  { %1388 = vrsqrt.f32 %v1087_v32  ;;  %v1084_v1 = vadd.f32 1e-05, %v1052_v16  ;;  %v1009_v3 = vmul.f32 0.03125, %v909_v48 }
 0x54a   :  { %1390 = vrsqrt.f32 %v1084_v1  ;;  %v1041_v13 = vmul.f32 %v1009_v3, %v1009_v3  ;;  %v1073_v58 = vsub.f32 %v1810_v18, %v1009_v3  ;;  %v1070_v1 = vsub.f32 %v1806_v15, %v1943_v62 }
 0x54b   :  { %v964_v59 = vpop.xlane.xlu1 %963 }
 0x54c   :  { %v1057_v11 = vsub.f32 %v1025_v6, %v1041_v13  ;;  %v1022_v12 = vmul.f32 0.03125, %v964_v59 }
 0x54e   :  { %v1089_v44 = vadd.f32 1e-05, %v1057_v11  ;;  %v1054_v19 = vsub.f32 %v1022_v12, %v1038_v8 }
 0x54f   :  { %v906_v20 = vpop.xlane.xlu1 %905 }
 0x550   :  { %1392 = vrsqrt.f32 %v1089_v44  ;;  %v1086_v27 = vadd.f32 1e-05, %v1054_v19  ;;  %v1955_v38 = vmul.f32 0.03125, %v906_v20 }
 0x551   :  { %v927_v21 = vpop.xlane.xlu0 %926 }
 0x552   :  { %1394 = vrsqrt.f32 %v1086_v27  ;;  %v1949_v31 = vmul.f32 0.03125, %v927_v21  ;;  %v1040_v49 = vmul.f32 %v1955_v38, %v1955_v38 }
 0x553   :  { %v915_v26 = vpop.xlane.xlu1 %914 }
 0x554   :  { %v1952_v29 = vmul.f32 0.03125, %v915_v26  ;;  %v1047_v0 = vmul.f32 %v1949_v31, %v1949_v31 }
 0x555   :  { %v1389_v56 = vpop.eup %1388  ;;  %v991_v30 = vpop.xlane.xlu0 %990 }
 0x556   :  { %v1119_v4 = vmul.f32 %v1389_v56, %v1071_v28  ;;  %v1043_v42 = vmul.f32 %v1952_v29, %v1952_v29  ;;  %v1031_v43 = vmul.f32 0.03125, %v991_v30 }
 0x557   :  { %v1391_v45 = vpop.eup %1390  ;;  %v970_v41 = vpop.xlane.xlu1 %969 }
 0x558   :  { %v1142_v14 = vmul.f32 %v1927_v9, %v1119_v4  ;;  %v1116_v10 = vmul.f32 %v1391_v45, %v1068_v37  ;;  %v1059_v24 = vsub.f32 %v1027_v35, %v1043_v42  ;;  %v1063_v50 = vsub.f32 %v1031_v43, %v1047_v0 }
 0x559   :  { %v1024_v51 = vmul.f32 0.03125, %v970_v41  ;;  %v1029_v35 = vmul.f32 0.03125, %v1947_v17  ;;  %v1075_v0 = vsub.f32 %v1817_v22, %v1952_v29  ;;  %v1079_v17 = vsub.f32 %v1851_v47, %v1949_v31 }
 0x55a   :  { %v1165_v40 = vadd.f32 %v1932_v25, %v1142_v14  ;;  %v1139_v46 = vmul.f32 %v1927_v9, %v1116_v10  ;;  %v1091_v39 = vadd.f32 1e-05, %v1059_v24  ;;  %v1095_v52 = vadd.f32 1e-05, %v1063_v50 }
 0x55b   :  { %v1056_v55 = vsub.f32 %v1024_v51, %v1040_v49  ;;  %v912_v33 = vpop.xlane.xlu1 %911  ;;  %v1072_v50 = vsub.f32 %v1847_v36, %v1955_v38 }
 0x55c   :  { %1181 = vst.msk [vmem:[%s2106_s10 + $0x18] sm:$0xff] %vm254_vm1, %v1165_v40  ;;  %v1162_v54 = vadd.f32 %v1932_v25, %v1139_v46  ;;  %1396 = vrsqrt.f32 %v1091_v39  ;;  %v1972_v16 = vmul.f32 0.03125, %v912_v33 }
 0x55d   :  { %v1393_v60 = vpop.eup %1392  ;;  %1398 = vrsqrt.f32 %v1095_v52  ;;  %v1088_v32 = vadd.f32 1e-05, %v1056_v55  ;;  %v933_v48 = vpop.xlane.xlu0 %932 }
 0x55e   :  { %1178 = vst.msk [vmem:[%s2106_s10] sm:$0xff] %vm254_vm1, %v1162_v54  ;;  %v1121_v5 = vmul.f32 %v1393_v60, %v1073_v58  ;;  %v1980_v6 = vmul.f32 0.03125, %v933_v48  ;;  %v1042_v8 = vmul.f32 %v1972_v16, %v1972_v16 }
 0x55f   :  { %v1395_v13 = vpop.eup %1394  ;;  %1400 = vrsqrt.f32 %v1088_v32  ;;  %v976_v18 = vpop.xlane.xlu1 %975 }
 0x560   :  { %v1144_v3 = vmul.f32 %v1927_v9, %v1121_v5  ;;  %v1118_v59 = vmul.f32 %v1395_v13, %v1070_v1  ;;  %v1026_v11 = vmul.f32 0.03125, %v976_v18  ;;  %v1049_v44 = vmul.f32 %v1980_v6, %v1980_v6 }
 0x561   :  { %v997_v12 = vpop.xlane.xlu0 %996  ;;  %v1074_v18 = vsub.f32 %v1865_v53, %v1972_v16 }
 0x562   :  { %v1167_v15 = vadd.f32 %v1932_v25, %v1144_v3  ;;  %v1141_v62 = vmul.f32 %v1927_v9, %v1118_v59  ;;  %v1033_v19 = vmul.f32 0.03125, %v997_v12  ;;  %v1058_v20 = vsub.f32 %v1026_v11, %v1042_v8 }
 0x563   :  { %v921_v27 = vpop.xlane.xlu1 %920  ;;  %v1081_v8 = vsub.f32 %v1869_v57, %v1980_v6 }
 0x564   :  { %1183 = vst.msk [vmem:[%s2106_s10 + $0x28] sm:$0xff] %vm254_vm1, %v1167_v15  ;;  %v1164_v21 = vadd.f32 %v1932_v25, %v1141_v62  ;;  %v1065_v26 = vsub.f32 %v1033_v19, %v1049_v44  ;;  %v1994_v28 = vmul.f32 0.03125, %v921_v27  ;;  %v1090_v56 = vadd.f32 1e-05, %v1058_v20 }
 0x566   :  { %1180 = vst.msk [vmem:[%s2106_s10 + $0x10] sm:$0xff] %vm254_vm1, %v1164_v21  ;;  %v1097_v37 = vadd.f32 1e-05, %v1065_v26  ;;  %v1045_v30 = vmul.f32 %v1994_v28, %v1994_v28  ;;  %1402 = vrsqrt.f32 %v1090_v56  ;;  %v1077_v53 = vsub.f32 %v1830_v34, %v1994_v28 }
 0x567   :  { %v918_v4 = vpop.xlane.xlu1 %917 }
 0x568   :  { %1404 = vrsqrt.f32 %v1097_v37  ;;  %v1061_v42 = vsub.f32 %v1029_v35, %v1045_v30  ;;  %v2005_v43 = vmul.f32 0.03125, %v918_v4 }
 0x569   :  { %v1397_v45 = vpop.eup %1396  ;;  %v939_v41 = vpop.xlane.xlu0 %938 }
 0x56a   :  { %v1399_v14 = vpop.eup %1398  ;;  %v1123_v10 = vmul.f32 %v1397_v45, %v1075_v0  ;;  %v1093_v24 = vadd.f32 1e-05, %v1061_v42  ;;  %v2011_v51 = vmul.f32 0.03125, %v939_v41  ;;  %v1044_v46 = vmul.f32 %v2005_v43, %v2005_v43 }
 0x56b   :  { %v1127_v49 = vmul.f32 %v1399_v14, %v1079_v17  ;;  %v982_v40 = vpop.xlane.xlu1 %981  ;;  %v1076_v0 = vsub.f32 %v1882_v61, %v2005_v43 }
 0x56c   :  { %v1401_v22 = vpop.eup %1400  ;;  %v1146_v29 = vmul.f32 %v1927_v9, %v1123_v10  ;;  %1406 = vrsqrt.f32 %v1093_v24  ;;  %v1028_v39 = vmul.f32 0.03125, %v982_v40  ;;  %v1051_v36 = vmul.f32 %v2011_v51, %v2011_v51 }
 0x56d   :  { %v1150_v47 = vmul.f32 %v1927_v9, %v1127_v49  ;;  %v1120_v31 = vmul.f32 %v1401_v22, %v1072_v50  ;;  %v1003_v52 = vpop.xlane.xlu0 %1002  ;;  %v1083_v17 = vsub.f32 %v1887_v2, %v2011_v51 }
 0x56e   :  { %v1169_v55 = vadd.f32 %v1932_v25, %v1146_v29  ;;  %v1060_v38 = vsub.f32 %v1028_v39, %v1044_v46  ;;  %v1035_v33 = vmul.f32 0.03125, %v1003_v52 }
 0x56f   :  { %v1173_v54 = vadd.f32 %v1932_v25, %v1150_v47  ;;  %v1143_v58 = vmul.f32 %v1927_v9, %v1120_v31  ;;  %v924_v60 = vpop.xlane.xlu1 %923 }
 0x570   :  { %1185 = vst.msk [vmem:[%s2106_s10 + $0x38] sm:$0xff] %vm254_vm1, %v1169_v55  ;;  %v1092_v32 = vadd.f32 1e-05, %v1060_v38  ;;  %v1067_v48 = vsub.f32 %v1035_v33, %v1051_v36  ;;  %v1014_v1 = vmul.f32 0.03125, %v924_v60 }
 0x571   :  { %1189 = vst.msk [vmem:[%s2106_s10 + $0x58] sm:$0xff] %vm254_vm1, %v1173_v54  ;;  %v1166_v5 = vadd.f32 %v1932_v25, %v1143_v58 }
 0x572   :  { %1408 = vrsqrt.f32 %v1092_v32  ;;  %v1099_v13 = vadd.f32 1e-05, %v1067_v48  ;;  %v1046_v11 = vmul.f32 %v1014_v1, %v1014_v1  ;;  %v1078_v2 = vsub.f32 %v1898_v7, %v1014_v1 }
 0x573   :  { %1182 = vst.msk [vmem:[%s2106_s10 + $0x20] sm:$0xff] %vm254_vm1, %v1166_v5  ;;  %v988_v3 = vpop.xlane.xlu1 %987  ;;  %v1403_v59 = vpop.eup %1402 }
 0x574   :  { %1410 = vrsqrt.f32 %v1099_v13  ;;  %v1030_v12 = vmul.f32 0.03125, %v988_v3  ;;  %v1122_v62 = vmul.f32 %v1403_v59, %v1074_v18 }
 0x575   :  { %v1405_v15 = vpop.eup %1404 }
 0x576   :  { %v1129_v44 = vmul.f32 %v1405_v15, %v1081_v8  ;;  %v1062_v19 = vsub.f32 %v1030_v12, %v1046_v11  ;;  %v1145_v20 = vmul.f32 %v1927_v9, %v1122_v62 }
 0x577   :  { %v930_v27 = vpop.xlane.xlu1 %929 }
 0x578   :  { %v1152_v21 = vmul.f32 %v1927_v9, %v1129_v44  ;;  %v1094_v16 = vadd.f32 1e-05, %v1062_v19  ;;  %v1016_v26 = vmul.f32 0.03125, %v930_v27  ;;  %v1168_v57 = vadd.f32 %v1932_v25, %v1145_v20 }
 0x579   :  { %v1407_v56 = vpop.eup %1406 }
 0x57a   :  { %v1175_v6 = vadd.f32 %v1932_v25, %v1152_v21  ;;  %v1125_v35 = vmul.f32 %v1407_v56, %v1077_v53  ;;  %1412 = vrsqrt.f32 %v1094_v16  ;;  %1184 = vst.msk [vmem:[%s2106_s10 + $0x30] sm:$0xff] %vm254_vm1, %v1168_v57  ;;  %v1048_v28 = vmul.f32 %v1016_v26, %v1016_v26 }
 0x57b   :  { %v994_v37 = vpop.xlane.xlu1 %993  ;;  %v1080_v46 = vsub.f32 %v1907_v63, %v1016_v26 }
 0x57c   :  { %1191 = vst.msk [vmem:[%s2106_s10 + $0x68] sm:$0xff] %vm254_vm1, %v1175_v6  ;;  %v1148_v34 = vmul.f32 %v1927_v9, %v1125_v35  ;;  %v1032_v30 = vmul.f32 0.03125, %v994_v37 }
 0x57e   :  { %v1171_v4 = vadd.f32 %v1932_v25, %v1148_v34  ;;  %v1064_v42 = vsub.f32 %v1032_v30, %v1048_v28 }
 0x57f   :  { %v1409_v45 = vpop.eup %1408 }
 0x580   :  { %1187 = vst.msk [vmem:[%s2106_s10 + $0x48] sm:$0xff] %vm254_vm1, %v1171_v4  ;;  %v1124_v41 = vmul.f32 %v1409_v45, %v1076_v0  ;;  %v1096_v14 = vadd.f32 1e-05, %v1064_v42 }
 0x581   :  { %v1411_v10 = vpop.eup %1410 }
 0x582   :  { %v1147_v24 = vmul.f32 %v1927_v9, %v1124_v41  ;;  %v1131_v50 = vmul.f32 %v1411_v10, %v1083_v17  ;;  %1414 = vrsqrt.f32 %v1096_v14 }
 0x584   :  { %v1170_v49 = vadd.f32 %v1932_v25, %v1147_v24  ;;  %v1154_v61 = vmul.f32 %v1927_v9, %v1131_v50 }
 0x586   :  { %1186 = vst.msk [vmem:[%s2106_s10 + $0x40] sm:$0xff] %vm254_vm1, %v1170_v49  ;;  %v1177_v43 = vadd.f32 %v1932_v25, %v1154_v61 }
 0x587   :  { %v1413_v51 = vpop.eup %1412 }
 0x588   :  { %1193 = vst.msk [vmem:[%s2106_s10 + $0x78] sm:$0xff] %vm254_vm1, %v1177_v43  ;;  %v1126_v40 = vmul.f32 %v1413_v51, %v1078_v2 }
 0x58a   :  { %v1149_v22 = vmul.f32 %v1927_v9, %v1126_v40 }
 0x58c   :  { %v1172_v29 = vadd.f32 %v1932_v25, %v1149_v22 }
 0x58e   :  { %1188 = vst.msk [vmem:[%s2106_s10 + $0x50] sm:$0xff] %vm254_vm1, %v1172_v29 }
 0x58f   :  { %v1415_v39 = vpop.eup %1414 }
 0x590   :  { %v1128_v7 = vmul.f32 %v1415_v39, %v1080_v46 }
 0x592   :  { %v1151_v47 = vmul.f32 %v1927_v9, %v1128_v7 }
 0x594   :  { %v1174_v31 = vadd.f32 %v1932_v25, %v1151_v47 }
 0x596   :  { %1190 = vst.msk [vmem:[%s2106_s10 + $0x60] sm:$0xff] %vm254_vm1, %v1174_v31 }
 0x597   :  { %v936_v52 = vpop.xlane.xlu1 %935 }
 0x598   :  { %v1018_v55 = vmul.f32 0.03125, %v936_v52 }
 0x59a   :  { %v1050_v38 = vmul.f32 %v1018_v55, %v1018_v55  ;;  %v1082_v63 = vsub.f32 %v1916_v23, %v1018_v55 }
 0x59b   :  { %v1000_v36 = vpop.xlane.xlu1 %999 }
 0x59c   :  { %v1034_v33 = vmul.f32 0.03125, %v1000_v36 }
 0x59e   :  { %v1066_v54 = vsub.f32 %v1034_v33, %v1050_v38 }
 0x5a0   :  { %v1098_v58 = vadd.f32 1e-05, %v1066_v54 }
 0x5a2   :  { %1416 = vrsqrt.f32 %v1098_v58 }
 0x5af   :  { %v1417_v60 = vpop.eup %1416 }
 0x5b0   :  { %v1130_v32 = vmul.f32 %v1417_v60, %v1082_v63 }
 0x5b2   :  { %v1153_v48 = vmul.f32 %v1927_v9, %v1130_v32 }
 0x5b4   :  { %v1176_v1 = vadd.f32 %v1932_v25, %v1153_v48 }
 0x5b6   :  { %1192 = vst.msk [vmem:[%s2106_s10 + $0x70] sm:$0xff] %vm254_vm1, %v1176_v1 }
 0x5b7   :  { %1438 = dma.done.wait [#allocation3], 32  }
 0x5b8   :  { %1439 = vsyncadd [#allocation3], 4294967264 }
 0x5b9   :  { %1211 = vsyncpa [#allocation3], 1 }

</bundles_post_ra>
